<compile_context>
chip_gen: v6e
topology: v6e:2x2x1
jax: 0.10.0
libtpu: 0.0.40
codegen_flags: <defaults>
</compile_context>

<pallas_src>
import jax
import jax.numpy as jnp
from jax.experimental import pallas as pl
from jax.experimental.pallas import tpu as pltpu

_LANE = 128
_TARGET_BLOCK_BYTES = 4 * 1024 * 1024  # ~4 MiB per grid step


def _exp_kernel(x_ref, o_ref):
    # Elementwise exp on the whole VMEM tile (EUP transcendental).
    o_ref[...] = jnp.exp(x_ref[...])


def _exp_2d(x2d: jax.Array, block_rows: int) -> jax.Array:
    """Runs the exp kernel over a lane-dense (rows, 128) slab."""
    rows, lane = x2d.shape
    grid = (pl.cdiv(rows, block_rows),)
    return pl.pallas_call(
        _exp_kernel,
        out_shape=jax.ShapeDtypeStruct((rows, lane), x2d.dtype),
        grid_spec=pltpu.PrefetchScalarGridSpec(
            num_scalar_prefetch=0,
            grid=grid,
            in_specs=[pl.BlockSpec((block_rows, lane), lambda i: (i, 0))],
            out_specs=pl.BlockSpec((block_rows, lane), lambda i: (i, 0)),
        ),
        compiler_params=pltpu.CompilerParams(
            dimension_semantics=("parallel",),
            # 2 (double-buffered) input + 2 output buffers of up to 4 MiB each
            # = 16 MiB; raise the scoped limit so this compiles on v5e too and
            # leaves headroom on v6e/v7x.
            vmem_limit_bytes=32 << 20,
        ),
    )(x2d)


def exp_pallas(x: jax.Array) -> jax.Array:
    """Computes jnp.exp(x) via a Pallas TPU kernel (torch.exp semantics)."""
    orig_shape = x.shape
    dtype = x.dtype
    if not jnp.issubdtype(dtype, jnp.floating):
        # torch.exp also rejects integer tensors.
        raise TypeError(f"exp_pallas requires a floating dtype, got {dtype}")

    n = x.size
    if n == 0:
        return x

    itemsize = jnp.dtype(dtype).itemsize
    # dtype-aware sublane packing: 8 rows for f32, 16 for bf16, 32 for 8-bit.
    sublane = max(8, 32 // itemsize)

    # Block rows targeting ~4 MiB per block, rounded down to a sublane multiple.
    max_block_rows = max(
        sublane, (_TARGET_BLOCK_BYTES // (_LANE * itemsize)) // sublane * sublane
    )

    flat = x.reshape(-1)

    if n % _LANE == 0:
        # Fast path: already lane-aligned — no pad, no slice, no extra HBM pass.
        rows = n // _LANE
        x2d = flat.reshape(rows, _LANE)
        block_rows = rows if rows <= max_block_rows else max_block_rows
        out2d = _exp_2d(x2d, block_rows)
        return out2d.reshape(orig_shape)

    # Irregular size: pad up to a full (sublane, 128) tile multiple, run, slice.
    tile = _LANE * sublane
    n_pad = ((n + tile - 1) // tile) * tile
    flat_p = jnp.pad(flat, (0, n_pad - n))
    rows = n_pad // _LANE
    x2d = flat_p.reshape(rows, _LANE)
    block_rows = rows if rows <= max_block_rows else max_block_rows
    out2d = _exp_2d(x2d, block_rows)
    return out2d.reshape(-1)[:n].reshape(orig_shape)


if __name__ == "__main__":
    key = jax.random.PRNGKey(0)

    # Small NCHW-style input consistent with the conv-model context
    # (lane-aligned fast path: 2*4*16*16 = 2048 elements).
    x = jax.random.normal(key, (2, 4, 16, 16), dtype=jnp.float32)
    y = exp_pallas(x)
    jax.block_until_ready(y)
    y_ref = jnp.exp(x)
    assert y.shape == x.shape and y.dtype == x.dtype
    assert jnp.allclose(y, y_ref, rtol=1e-6, atol=1e-6)

    # Irregular-size fallback path (105 elements, not a multiple of 128).
    x_odd = jax.random.normal(jax.random.PRNGKey(1), (3, 5, 7), dtype=jnp.float32)
    y_odd = exp_pallas(x_odd)
    jax.block_until_ready(y_odd)
    assert y_odd.shape == x_odd.shape and y_odd.dtype == x_odd.dtype
    assert jnp.allclose(y_odd, jnp.exp(x_odd), rtol=1e-6, atol=1e-6)

    print("KERNEL_OK")
</pallas_src>

<mosaic_0001>
module attributes {stable_mosaic.version = 11 : i64} {
  func.func @_exp_kernel(%arg0: i32, %arg1: memref<16x128xf32, #tpu.memory_space<vmem>>, %arg2: memref<16x128xf32, #tpu.memory_space<vmem>>) attributes {dimension_semantics = [#tpu.dimension_semantics<parallel>], iteration_bounds = array<i64: 1>, scalar_prefetch = 0 : i64, scratch_operands = 0 : i64, tpu.core_type = #tpu.core_type<tc>, window_params = [{transform_indices = @transform_0, window_bounds = array<i64: 16, 128>}, {transform_indices = @transform_1, window_bounds = array<i64: 16, 128>}]} {
    %c0 = arith.constant 0 : index
    %c0_0 = arith.constant 0 : index
    %0 = vector.load %arg1[%c0, %c0_0] : memref<16x128xf32, #tpu.memory_space<vmem>>, vector<16x128xf32>
    %1 = math.exp %0 : vector<16x128xf32>
    %c0_1 = arith.constant 0 : index
    %c0_2 = arith.constant 0 : index
    %2 = vector.load %arg2[%c0_1, %c0_2] : memref<16x128xf32, #tpu.memory_space<vmem>>, vector<16x128xf32>
    tpu.vector_store %arg2[%c0_1, %c0_2], %1 {strides = array<i32>} : memref<16x128xf32, #tpu.memory_space<vmem>>, vector<16x128xf32>,
    return
  }
  func.func @transform_0(%arg0: i32) -> (i32, i32) {
    %c0_i32 = arith.constant 0 : i32
    %c0_i32_0 = arith.constant 0 : i32
    return %arg0, %c0_i32 : i32, i32
  }
  func.func @transform_1(%arg0: i32) -> (i32, i32) {
    %c0_i32 = arith.constant 0 : i32
    %c0_i32_0 = arith.constant 0 : i32
    return %arg0, %c0_i32 : i32, i32
  }
}

</mosaic_0001>

<bundles_post_ra>
// kernel: tpu_custom_call.1
= control target key start
LH: loop header
LB: loop body
LE: loop exit
PB: predicated region body
PF: predicated region fallthrough
CT: control target
= control target key end

     0   :  { %6 = vsyncpa [#allocation3], 0  ;;  %s120_s0 = inlined_call_operand.hbm [shape: f32[16,128], index: 0, kind: input, shape index: {}]   ;;  %s121_s1 = inlined_call_operand.hbm [shape: f32[16,128], index: 1, kind: output, shape index: {}]  }
   0x1   :  { %7 = vsyncpa [#allocation4], 0  ;;  %s100_s6 = smov [#allocation2]  }
   0x2   :  { %s13_s7 = sshll.u32 %s100_s6, 4  ;;  %s14_s7 = int_to_ptr.vmem [resolvable:$true] %s13_s7 }
   0x3   :  { %s64_s8 = scalar_lea.vmem %s14_s7, 256  ;;  %p69_p1 = scmp.lt.s32.totalorder %s14_s7, %s14_s7 }
   0x4   :  { %p65_p0 = scmp.ne.s32.totalorder %s14_s7, %s64_s8  ;;  %p70_p2 = scmp.lt.s32.totalorder %s64_s8, %s64_s8 }
   0x6   :  { %p71_p3 = por %p70_p2, %p69_p1 }
   0x8   :  { %p72_p4 = pnand %p71_p3, %p65_p0 }
   0xa   :  { %75 = shalt.err (!%p72_p4)
}
   0xb   :  { %s101_s9 = smov 128   ;;  %s102_s10 = smov 8  }
   0xc   :  { %19 = dma.hbm_to_vmem [thread:$0]  %s120_s0, 256, %s14_s7, [#allocation3], %s101_s9, %s101_s9, %s102_s10  }
   0xd   :  { %96 = dma.done.wait [#allocation3], 256  }
   0xe   :  { %97 = vsyncadd [#allocation3], 4294967040  ;;  %v23_v0 = vld [vmem:[#allocation2] sm:$0xff]  ;;  %v24_v1 = vld [vmem:[#allocation2 + $0x8] sm:$0xff]  ;;  %s103_s13 = smov [#allocation5]  }
   0xf   :  { %v25_v2 = vmul.f32 1.442695, %v23_v0  ;;  %v27_v3 = vmul.f32 1.442695, %v24_v1  ;;  %s36_s14 = sshll.u32 %s103_s13, 4  ;;  %s37_s14 = int_to_ptr.vmem [resolvable:$true] %s36_s14 }
  0x10   :  { %s76_s15 = scalar_lea.vmem %s37_s14, 256  ;;  %p81_p6 = scmp.lt.s32.totalorder %s37_s14, %s37_s14 }
  0x11   :  { %52 = vpow2.f32 %v25_v2  ;;  %p77_p5 = scmp.ne.s32.totalorder %s37_s14, %s76_s15  ;;  %p82_p7 = scmp.lt.s32.totalorder %s76_s15, %s76_s15 }
  0x12   :  { %54 = vpow2.f32 %v27_v3 }
  0x13   :  { %p83_p8 = por %p82_p7, %p81_p6 }
  0x15   :  { %p84_p9 = pnand %p83_p8, %p77_p5 }
  0x1e   :  { %v53_v4 = vpop.eup %52 }
  0x1f   :  { %v55_v5 = vpop.eup %54  ;;  %29 = vst [vmem:[#allocation5] sm:$0xff] %v53_v4 }
  0x20   :  { %30 = vst [vmem:[#allocation5 + $0x8] sm:$0xff] %v55_v5 }
  0x21   :  { %87 = shalt.err (!%p84_p9)
}
  0x22   :  { %42 = dma.vmem_to_hbm [thread:$0]  %s37_s14, 256, %s121_s1, [#allocation4], %s101_s9, %s101_s9, %s102_s10  }
  0x23   :  { %98 = dma.done.wait [#allocation4], 256  }
  0x24   :  { %99 = vsyncadd [#allocation4], 4294967040 }
  0x25   :  { %46 = vsyncpa [#allocation3], 1 }
  0x26   :  { %47 = vsyncpa [#allocation4], 1 }

</bundles_post_ra>
